<compile_context>
chip_gen: v5e
topology: v5e:2x2
jax: 0.10.0
libtpu: 0.0.40
codegen_flags: <defaults>
</compile_context>

<pallas_src>
import numpy as np
import jax
import jax.numpy as jnp
from jax.experimental import pallas as pl
from jax.experimental.pallas import tpu as pltpu

BN_EPS = 1e-5


# ---------------------------------------------------------------------------
# Kernel A: streamed segment-sum (aggregation) over x -> per-split partial (C, D) sums.
# Grid = (num_splits ["parallel"], tiles_per_split ["arbitrary" reduction]).
# ---------------------------------------------------------------------------
def _make_agg_kernel(C, block_n, n_rows, tiles_per_split, stream_dtype):
    def kernel(starts_ref, ends_ref, x_ref, part_ref):
        t = pl.program_id(1)

        @pl.when(t == 0)
        def _init():
            part_ref[...] = jnp.zeros_like(part_ref)

        # Global element offset of this x block.
        tile_idx = pl.program_id(0) * tiles_per_split + t
        off = tile_idx * block_n

        # Loop-invariant local iotas (hoistable by Mosaic); per-step work is scalar subtracts.
        lane_ids = jax.lax.broadcasted_iota(jnp.int32, (C, block_n), 1)   # (C, TN)
        row_ids = jax.lax.broadcasted_iota(jnp.int32, (block_n, 1), 0)    # (TN, 1)

        # Selection matrix for the segment sums (0/1 is exact in bf16 too).
        sel = ((lane_ids >= starts_ref[...] - off) &
               (lane_ids < ends_ref[...] - off)).astype(stream_dtype)     # (C, TN)

        # Zero rows past the end of x: the tail of the last partial block (and any clamped
        # out-of-range step) must be explicitly zeroed -- sel=0 does not mask 0*NaN.
        x_tile = jnp.where(row_ids < (n_rows - off), x_ref[...], 0)       # (TN, D)

        part_ref[...] += jnp.dot(sel, x_tile,
                                 preferred_element_type=jnp.float32)[None]

    return kernel


# ---------------------------------------------------------------------------
# Kernel B: combine split partials + MLP head (Linear -> train-mode BN -> ReLU, x3, Linear).
# Single invocation (no grid); everything is tiny and fully resident in VMEM.
# ---------------------------------------------------------------------------
def _head_kernel(part_ref,
                 w1_ref, b1_ref, g1_ref, bb1_ref,
                 w2_ref, b2_ref, g2_ref, bb2_ref,
                 w3_ref, b3_ref, g3_ref, bb3_ref,
                 w4_ref, b4_ref,
                 out_ref):
    def bn_relu(h, g_ref, b_ref):
        mean = jnp.mean(h, axis=0, keepdims=True)
        var = jnp.mean((h - mean) ** 2, axis=0, keepdims=True)   # biased var (PyTorch train BN)
        hn = (h - mean) * jax.lax.rsqrt(var + BN_EPS)
        return jnp.maximum(hn * g_ref[...] + b_ref[...], 0.0)

    h = jnp.sum(part_ref[...], axis=0)                            # (C, D) combine over splits
    h = bn_relu(jnp.dot(h, w1_ref[...], preferred_element_type=jnp.float32) + b1_ref[...],
                g1_ref, bb1_ref)
    h = bn_relu(jnp.dot(h, w2_ref[...], preferred_element_type=jnp.float32) + b2_ref[...],
                g2_ref, bb2_ref)
    h = bn_relu(jnp.dot(h, w3_ref[...], preferred_element_type=jnp.float32) + b3_ref[...],
                g3_ref, bb3_ref)
    out_ref[...] = (jnp.dot(h, w4_ref[...], preferred_element_type=jnp.float32) + b4_ref[...])


def _pick_block_n(N, D, elt_bytes, requested):
    """Largest N-tile (multiple of 8) whose double-buffered x stream fits the VMEM budget."""
    n_ceil8 = -(-max(int(N), 1) // 8) * 8
    if requested is not None:
        return max(8, min((int(requested) // 8) * 8, n_ceil8))
    try:
        vmem_bytes = int(pltpu.get_tpu_info().vmem_capacity_bytes)
    except Exception:
        vmem_bytes = 64 * 1024 * 1024   # conservative: v7x physical per-TC VMEM
    # Keep the x double buffer well under the scoped-VMEM default of every generation.
    budget = min(vmem_bytes // 8, 12 * 1024 * 1024)
    blk = (budget // (2 * D * elt_bytes) // 8) * 8   # 2 = default double buffering
    return max(8, min(blk, 8192, n_ceil8))


def simple_aggreg_net_forward(x, corelen, params, *, block_n=None, use_bf16_stream=False):
    """Pallas implementation of SimpleAggregNet.forward(x, corelen)."""
    N = int(x.shape[0])
    D = int(np.prod(x.shape[1:]))
    stream_dtype = jnp.bfloat16 if use_bf16_stream else jnp.float32
    elt_bytes = 2 if use_bf16_stream else 4
    # No host-side padding: exactly one HBM pass over x; last partial tile is masked in-kernel.
    xf = x.reshape(N, D).astype(stream_dtype)

    starts = corelen.astype(jnp.int32).reshape(-1)
    C = int(starts.shape[0])
    ends = jnp.concatenate([starts[1:], jnp.array([N], dtype=jnp.int32)])
    starts_col = starts.reshape(C, 1)
    ends_col = ends.reshape(C, 1)

    blk = _pick_block_n(N, D, elt_bytes, block_n)
    total_tiles = -(-N // blk)
    # Leading "parallel" axis of size 2 lets v7x shard the stream across both TensorCores;
    # on 1-TC chips it simply runs sequentially (one extra tiny output block).
    num_splits = 2 if total_tiles >= 2 else 1
    tiles_per_split = -(-total_tiles // num_splits)

    (w1, b1, g1, bb1, w2, b2, g2, bb2, w3, b3, g3, bb3, w4, b4) = params
    num_classes = int(w4.shape[1])

    def x_index_map(c, t):
        # Clamp out-of-range steps (odd tile counts) onto the last valid block;
        # the in-kernel row mask zeroes their contribution.
        return (jnp.minimum(c * tiles_per_split + t, total_tiles - 1), 0)

    partials = pl.pallas_call(
        _make_agg_kernel(C, blk, N, tiles_per_split, stream_dtype),
        out_shape=jax.ShapeDtypeStruct((num_splits, C, D), jnp.float32),
        grid_spec=pltpu.PrefetchScalarGridSpec(
            num_scalar_prefetch=0,
            grid=(num_splits, tiles_per_split),
            in_specs=[
                pl.BlockSpec((C, 1), lambda c, t: (0, 0)),    # starts (resident)
                pl.BlockSpec((C, 1), lambda c, t: (0, 0)),    # ends   (resident)
                pl.BlockSpec((blk, D), x_index_map),          # streamed x tiles
            ],
            out_specs=pl.BlockSpec((1, C, D), lambda c, t: (c, 0, 0)),  # per-split accumulator
        ),
        compiler_params=pltpu.CompilerParams(
            dimension_semantics=("parallel", "arbitrary")),
    )(starts_col, ends_col, xf)

    weights = [w1, b1, g1, bb1, w2, b2, g2, bb2, w3, b3, g3, bb3, w4, b4]
    return pl.pallas_call(
        _head_kernel,
        out_shape=jax.ShapeDtypeStruct((C, num_classes), jnp.float32),
    )(partials, *weights)


def init_params(key, input_dim, lin1, lin2, lin3, num_classes):
    """Deterministic synthetic parameters. Linear weights stored pre-transposed as (in, out)."""
    dims = [(input_dim, lin1), (lin1, lin2), (lin2, lin3), (lin3, num_classes)]
    keys = jax.random.split(key, 2 * len(dims))
    params = []
    for idx, (din, dout) in enumerate(dims):
        bound = 1.0 / np.sqrt(din)
        w = jax.random.uniform(keys[2 * idx], (din, dout), jnp.float32, -bound, bound)
        b = jax.random.uniform(keys[2 * idx + 1], (1, dout), jnp.float32, -bound, bound)
        params.extend([w, b])
        if idx < 3:  # BatchNorm1d after first three linears (torch init: weight=1, bias=0)
            params.extend([jnp.ones((1, dout), jnp.float32),
                           jnp.zeros((1, dout), jnp.float32)])
    return tuple(params)


def reference_forward(x, corelen, params):
    """Pure-JAX reference mirroring the PyTorch module (train-mode BN)."""
    N = x.shape[0]
    D = int(np.prod(x.shape[1:]))
    xf = x.reshape(N, D).astype(jnp.float32)
    starts = np.asarray(corelen)
    ends = np.append(starts[1:], N)
    rows = [jnp.sum(xf[int(s):int(e)], axis=0) for s, e in zip(starts, ends)]
    h = jnp.stack(rows, axis=0)
    (w1, b1, g1, bb1, w2, b2, g2, bb2, w3, b3, g3, bb3, w4, b4) = params

    def bn_relu(h, g, b):
        mean = jnp.mean(h, axis=0, keepdims=True)
        var = jnp.mean((h - mean) ** 2, axis=0, keepdims=True)
        return jnp.maximum((h - mean) / jnp.sqrt(var + BN_EPS) * g + b, 0.0)

    h = bn_relu(h @ w1 + b1, g1, bb1)
    h = bn_relu(h @ w2 + b2, g2, bb2)
    h = bn_relu(h @ w3 + b3, g3, bb3)
    return h @ w4 + b4


if __name__ == "__main__":
    key = jax.random.PRNGKey(0)
    k_x, k_p = jax.random.split(key)

    # Small shapes consistent with the module: N=10 instances, per-instance features (4, 8) -> D=32
    N, feat = 10, (4, 8)
    input_dim = int(np.prod(feat))          # 32
    lin1 = lin2 = lin3 = 32
    num_classes = 2

    x = jax.random.normal(k_x, (N,) + feat, dtype=jnp.float32)
    corelen = jnp.array([0, 3, 7], dtype=jnp.int32)   # 3 cores: rows [0:3), [3:7), [7:10)
    params = init_params(k_p, input_dim, lin1, lin2, lin3, num_classes)

    ref = jax.block_until_ready(reference_forward(x, corelen, params))

    # 1) Auto-sized tile (single tile, single split path).
    out = jax.block_until_ready(simple_aggreg_net_forward(x, corelen, params))
    np.testing.assert_allclose(np.asarray(out), np.asarray(ref), rtol=1e-3, atol=1e-4)

    # 2) Forced tiny tile -> 2 tiles over 2 splits: exercises the parallel split,
    #    cross-tile accumulation and the partial-last-tile masking path.
    out2 = jax.block_until_ready(
        simple_aggreg_net_forward(x, corelen, params, block_n=8))
    np.testing.assert_allclose(np.asarray(out2), np.asarray(ref), rtol=1e-3, atol=1e-4)

    # 3) Optional bf16 x stream: compare against a reference fed bf16-quantized x.
    out3 = jax.block_until_ready(
        simple_aggreg_net_forward(x, corelen, params, block_n=8, use_bf16_stream=True))
    ref_bf16 = jax.block_until_ready(
        reference_forward(x.astype(jnp.bfloat16).astype(jnp.float32), corelen, params))
    np.testing.assert_allclose(np.asarray(out3), np.asarray(ref_bf16), rtol=1e-3, atol=1e-4)

    print("KERNEL_OK")
</pallas_src>

<mosaic_0001>
module attributes {stable_mosaic.version = 11 : i64} {
  func.func @kernel(%arg0: i32, %arg1: i32, %arg2: memref<3x1xi32, #tpu.memory_space<vmem>>, %arg3: memref<3x1xi32, #tpu.memory_space<vmem>>, %arg4: memref<16x32xf32, #tpu.memory_space<vmem>>, %arg5: memref<1x3x32xf32, #tpu.memory_space<vmem>>) attributes {dimension_semantics = [#tpu.dimension_semantics<parallel>, #tpu.dimension_semantics<arbitrary>], iteration_bounds = array<i64: 1, 1>, scalar_prefetch = 0 : i64, scratch_operands = 0 : i64, tpu.core_type = #tpu.core_type<tc>, window_params = [{pipeline_mode = #tpu.pipeline_mode<synchronous>, transform_indices = @transform_0, window_bounds = array<i64: 3, 1>}, {pipeline_mode = #tpu.pipeline_mode<synchronous>, transform_indices = @transform_1, window_bounds = array<i64: 3, 1>}, {transform_indices = @transform_2, window_bounds = array<i64: 16, 32>}, {transform_indices = @transform_3, window_bounds = array<i64: 1, 3, 32>}]} {
    %c0_i32 = arith.constant 0 : i32
    %0 = arith.cmpi eq, %arg1, %c0_i32 : i32
    %1 = arith.extui %0 : i1 to i32
    %c0_i32_0 = arith.constant 0 : i32
    %2 = arith.cmpi ne, %1, %c0_i32_0 : i32
    scf.if %2 {
      %cst_13 = arith.constant 0.000000e+00 : f32
      %35 = vector.broadcast %cst_13 : f32 to vector<1x3x32xf32>
      %c0_14 = arith.constant 0 : index
      %c0_15 = arith.constant 0 : index
      %c0_16 = arith.constant 0 : index
      %36 = vector.load %arg5[%c0_14, %c0_15, %c0_16] : memref<1x3x32xf32, #tpu.memory_space<vmem>>, vector<1x3x32xf32>
      tpu.vector_store %arg5[%c0_14, %c0_15, %c0_16], %35 {strides = array<i32>} : memref<1x3x32xf32, #tpu.memory_space<vmem>>, vector<1x3x32xf32>,
    } else {
    }
    %c1_i32 = arith.constant 1 : i32
    %3 = arith.muli %arg0, %c1_i32 : i32
    %4 = arith.addi %3, %arg1 : i32
    %c16_i32 = arith.constant 16 : i32
    %5 = arith.muli %4, %c16_i32 : i32
    %6 = tpu.iota {dimensions = array<i32: 1>} : vector<3x16xi32>
    %7 = tpu.iota {dimensions = array<i32: 0>} : vector<16x1xi32>
    %c0 = arith.constant 0 : index
    %c0_1 = arith.constant 0 : index
    %8 = vector.load %arg2[%c0, %c0_1] : memref<3x1xi32, #tpu.memory_space<vmem>>, vector<3x1xi32>
    %9 = vector.broadcast %5 : i32 to vector<3x1xi32>
    %10 = arith.subi %8, %9 : vector<3x1xi32>
    %11 = vector.broadcast %10 : vector<3x1xi32> to vector<3x16xi32>
    %12 = arith.cmpi sge, %6, %11 : vector<3x16xi32>
    %c0_2 = arith.constant 0 : index
    %c0_3 = arith.constant 0 : index
    %13 = vector.load %arg3[%c0_2, %c0_3] : memref<3x1xi32, #tpu.memory_space<vmem>>, vector<3x1xi32>
    %14 = vector.broadcast %5 : i32 to vector<3x1xi32>
    %15 = arith.subi %13, %14 : vector<3x1xi32>
    %16 = vector.broadcast %15 : vector<3x1xi32> to vector<3x16xi32>
    %17 = arith.cmpi slt, %6, %16 : vector<3x16xi32>
    %18 = arith.andi %12, %17 : vector<3x16xi1>
    %19 = arith.extui %18 : vector<3x16xi1> to vector<3x16xi32>
    %20 = arith.sitofp %19 : vector<3x16xi32> to vector<3x16xf32>
    %c10_i32 = arith.constant 10 : i32
    %21 = arith.subi %c10_i32, %5 : i32
    %22 = vector.broadcast %21 : i32 to vector<16x1xi32>
    %23 = arith.cmpi slt, %7, %22 : vector<16x1xi32>
    %c0_4 = arith.constant 0 : index
    %c0_5 = arith.constant 0 : index
    %24 = vector.load %arg4[%c0_4, %c0_5] : memref<16x32xf32, #tpu.memory_space<vmem>>, vector<16x32xf32>
    %c0_i32_6 = arith.constant 0 : i32
    %25 = arith.sitofp %c0_i32_6 : i32 to f32
    %26 = vector.shape_cast %23 : vector<16x1xi1> to vector<16x1xi1>
    %27 = vector.broadcast %26 : vector<16x1xi1> to vector<16x32xi1>
    %28 = vector.broadcast %25 : f32 to vector<16x32xf32>
    %29 = arith.select %27, %24, %28 : vector<16x32xi1>, vector<16x32xf32>
    %c0_7 = arith.constant 0 : index
    %c0_8 = arith.constant 0 : index
    %c0_9 = arith.constant 0 : index
    %30 = vector.load %arg5[%c0_7, %c0_8, %c0_9] : memref<1x3x32xf32, #tpu.memory_space<vmem>>, vector<1x3x32xf32>
    %cst = arith.constant dense<0.000000e+00> : vector<3x32xf32>
    %31 = tpu.matmul %20, %29, %cst {dimension_numbers = #tpu.dot_dimension_numbers<[1], [0], [0], [1], [0, 0, 1, 1], [], []>} : vector<3x16xf32>, vector<16x32xf32>, vector<3x32xf32> -> vector<3x32xf32>
    %32 = vector.shape_cast %31 : vector<3x32xf32> to vector<1x3x32xf32>
    %33 = arith.addf %30, %32 : vector<1x3x32xf32>
    %c0_10 = arith.constant 0 : index
    %c0_11 = arith.constant 0 : index
    %c0_12 = arith.constant 0 : index
    %34 = vector.load %arg5[%c0_10, %c0_11, %c0_12] : memref<1x3x32xf32, #tpu.memory_space<vmem>>, vector<1x3x32xf32>
    tpu.vector_store %arg5[%c0_10, %c0_11, %c0_12], %33 {strides = array<i32>} : memref<1x3x32xf32, #tpu.memory_space<vmem>>, vector<1x3x32xf32>,
    return
  }
  func.func @transform_0(%arg0: i32, %arg1: i32) -> (i32, i32) {
    %c0_i32 = arith.constant 0 : i32
    %c0_i32_0 = arith.constant 0 : i32
    %c0_i32_1 = arith.constant 0 : i32
    return %c0_i32, %c0_i32_0 : i32, i32
  }
  func.func @transform_1(%arg0: i32, %arg1: i32) -> (i32, i32) {
    %c0_i32 = arith.constant 0 : i32
    %c0_i32_0 = arith.constant 0 : i32
    %c0_i32_1 = arith.constant 0 : i32
    return %c0_i32, %c0_i32_0 : i32, i32
  }
  func.func @transform_2(%arg0: i32, %arg1: i32) -> (i32, i32) {
    %c1_i32 = arith.constant 1 : i32
    %0 = arith.muli %arg0, %c1_i32 : i32
    %1 = arith.addi %0, %arg1 : i32
    %c0_i32 = arith.constant 0 : i32
    %2 = arith.minsi %1, %c0_i32 : i32
    %c0_i32_0 = arith.constant 0 : i32
    %c0_i32_1 = arith.constant 0 : i32
    return %2, %c0_i32_0 : i32, i32
  }
  func.func @transform_3(%arg0: i32, %arg1: i32) -> (i32, i32, i32) {
    %c0_i32 = arith.constant 0 : i32
    %c0_i32_0 = arith.constant 0 : i32
    %c0_i32_1 = arith.constant 0 : i32
    return %arg0, %c0_i32, %c0_i32_0 : i32, i32, i32
  }
}

</mosaic_0001>

<bundles_post_ra>
// kernel: tpu_custom_call.1
= control target key start
LH: loop header
LB: loop body
LE: loop exit
PB: predicated region body
PF: predicated region fallthrough
CT: control target
= control target key end

     0   :  { %8 = vsyncpa [#allocation3], 0  ;;  %s151_s15 = smov [#allocation2]   ;;  %s152_s17 = smov 128   ;;  %s196_s0 = inlined_call_operand.vmem [shape: s32[3,1], index: 0, kind: input, shape index: {}]   ;;  %s197_s1 = inlined_call_operand.vmem [shape: s32[3,1], index: 1, kind: input, shape index: {}]   ;;  %s198_s2 = inlined_call_operand.hbm [shape: f32[10,32], index: 2, kind: input, shape index: {}]   ;;  %s199_s3 = inlined_call_operand.vmem [shape: f32[1,3,32], index: 3, kind: output, shape index: {}]  }
   0x1   :  { %s23_s14 = sshll.u32 %s198_s2, 4  ;;  %s25_s16 = sshll.u32 %s151_s15, 4  ;;  %s24_s14 = int_to_ptr.hbm [resolvable:$true] %s23_s14  ;;  %s26_s16 = int_to_ptr.vmem [resolvable:$true] %s25_s16 }
   0x2   :  { %s153_s18 = smov 8  }
   0x3   :  { %31 = dma.hbm_to_vmem [thread:$0]  %s24_s14, 256, %s26_s16, [#allocation3], %s152_s17, %s152_s17, %s153_s18  }
   0x4   :  { %149 = dma.done.wait [#allocation3], 256  }
   0x5   :  { %150 = vsyncadd [#allocation3], 4294967040  ;;  %v154_v0 = vmov 0   ;;  %v53_v1 = vld [vmem:[%s196_s0] sm:$0x7]  ;;  %v48_v3 = vlaneseq  ;;  %v74_v6 = vld [vmem:[#allocation2 + $0x8] sm:$0xff] }
   0x6   :  { %124 = vset.pattern.permute.xlu0 %v154_v0  ;;  %v60_v2 = vld [vmem:[%s197_s1] sm:$0x7]  ;;  %vm44_vm1 = vcmask 256000   ;;  %v155_v8 = vmov 0.0   ;;  %vm82_vm4 = vcmask 130048  }
   0x7   :  { %57 = vperm.xlu0 %124, %v53_v1   ;;  %v51_v4 = vshrl.u32 %v48_v3, 7  ;;  %v73_v7 = vld [vmem:[#allocation2] sm:$0xff]  ;;  %45 = vst.msk [vmem:[%s199_s3] sm:$0x7] %vm44_vm1, %v155_v8  ;;  %v49_v10 = vand.u32 127, %v48_v3 }
   0x9   :  { %v52_v5 = vadd.s32 8, %v51_v4 }
   0xb   :  { %vm72_vm0 = vcmp.lt.s32.totalorder %v52_v5, 10 }
   0xc   :  { %117 = vmatpush.msk.msra.mxu0 %vm72_vm0, %v74_v6 }
   0xe   :  { %101 = vmatpush.msra.mxu0 %v73_v7  ;;  %v81_v13 = vld [vmem:[%s199_s3] sm:$0x7] }
   0xf   :  { %63 = vperm.xlu0 %124, %v60_v2  }
  0x79   :  { %v58_v9 = vpop.permute.xlu0 %57 }
  0x7a   :  { %vm59_vm2 = vcmp.ge.s32.totalorder %v49_v10, %v58_v9 }
  0x81   :  { %v64_v11 = vpop.permute.xlu0 %63 }
  0x82   :  { %vm65_vm3 = vcmp.lt.s32.totalorder %v49_v10, %v64_v11 }
  0x83   :  { %vm66_vm5 = vmand %vm59_vm2, %vm65_vm3 }
  0x84   :  { %v116_v12 = vsel %vm66_vm5, 1.0, %v155_v8 }
  0x85   :  { %118 = vmatmul.msk.f32.vlgmr.msra.gmra.mxu0 %vm82_vm4, %v116_v12 }
 0x102   :  { %v103_v14 = vpop.f32.mrf.mxu0 }
 0x103   :  { %v106_v15 = vadd.f32 %v103_v14, %v81_v13 }
 0x105   :  { %108 = vst.msk [vmem:[%s199_s3] sm:$0x7] %vm44_vm1, %v106_v15 }
 0x106   :  { %113 = vsyncpa [#allocation3], 1 }

</bundles_post_ra>
